<compile_context>
chip_gen: v7x
topology: tpu7x:2x2x1
jax: 0.10.0
libtpu: 0.0.40
codegen_flags: <defaults>
</compile_context>

<pallas_src>
import jax
import jax.numpy as jnp
from jax.experimental import pallas as pl
from jax.experimental.pallas import tpu as pltpu

LATENT = 4      # VAE latent dim (fc31 / fc32 output width)
SLAB = 128      # lane-dense packed width: z in lanes [0,4), label in [4,8)


def _pad128(n):
    return ((n + 127) // 128) * 128


def _make_kernel(bias_offsets, s2, s4, s):
    """Build the fused kernel; bias offsets / layer widths are static ints."""
    b1o, b2o, bho, b4o, b5o, b61o = bias_offsets

    def kernel(x_ref, eps_ref, w1, w2, wh, w4, w5, w61, bias_ref,
               slab_ref, dec_ref):
        f32 = jnp.float32
        bf16 = jnp.bfloat16

        def linear(h, w_ref, boff, width):
            # bf16 MXU matmul with f32 accumulation, f32 bias add (VPU).
            y = jnp.dot(h.astype(bf16), w_ref[...], preferred_element_type=f32)
            return y + bias_ref[:, boff:boff + width]

        # ---- encoder: relu(fc1) -> relu(fc2) -> merged (mu|logvar) head ----
        h = jnp.maximum(linear(x_ref[...], w1, b1o, s2), 0.0)
        h = jnp.maximum(linear(h, w2, b2o, s4), 0.0)
        # head: (TB, 128) with mu in lanes [0,4), logvar in [4,8), zeros else.
        head = linear(h, wh, bho, SLAB)

        lane = jax.lax.broadcasted_iota(jnp.int32, head.shape, 1)
        latent_mask = lane < LATENT

        # ---- reparametrize: z = eps * exp(0.5*logvar) + mu (128-lane wide) ----
        mu = jnp.where(latent_mask, head, 0.0)
        logvar = pltpu.roll(head, shift=SLAB - LATENT, axis=1)  # logvar -> lanes [0,4)
        # eps_ref is zero beyond lane LATENT, so z is exactly 0 outside [0,4).
        z = eps_ref[...] * jnp.exp(0.5 * logvar) + mu

        # ---- label = softmax(z) over the LATENT lanes (masked softmax) ----
        zmax = jnp.max(jnp.where(latent_mask, z, -jnp.inf), axis=1, keepdims=True)
        ez = jnp.where(latent_mask, jnp.exp(z - zmax), 0.0)
        label = ez * pl.reciprocal(jnp.sum(ez, axis=1, keepdims=True), approx=True)

        # ---- pack z (lanes [0,4)) and label (lanes [4,8)) into one slab ----
        # roll moves label to lanes [4,8); single unmasked 128-lane store.
        slab_ref[...] = z + pltpu.roll(label, shift=LATENT, axis=1)

        # ---- decoder: relu(fc4) -> relu(fc5) -> sigmoid(fc61) ----
        # z stays 128-wide; w4 is zero-padded to (128, s4) so no narrow slice.
        d = jnp.maximum(linear(z, w4, b4o, s4), 0.0)
        d = jnp.maximum(linear(d, w5, b5o, s2), 0.0)
        dec_ref[...] = jax.nn.sigmoid(linear(d, w61, b61o, s))

    return kernel


def vae_forward(packed, x, eps, *, batch_tile=None):
    """Fused VAE forward: returns (z, decoded, label) like the PyTorch module."""
    B, s = x.shape
    s2, s4 = s // 2, s // 4
    TB = batch_tile if batch_tile is not None else min(B, 256)
    assert TB % 8 == 0 and B % TB == 0, (B, TB)

    # eps zero-padded to 128 lanes so the reparametrize math stays lane-dense.
    eps128 = jnp.pad(eps.astype(jnp.float32), ((0, 0), (0, SLAB - LATENT)))

    kernel = _make_kernel(packed["bias_offsets"], s2, s4, s)
    weights = [packed[k] for k in ("w1", "w2", "wh", "w4", "w5", "w61")]
    bpack = packed["bpack"]

    def batch_spec(width):
        return pl.BlockSpec((TB, width), lambda i: (i, 0))

    def resident_spec(arr):
        # Constant block index -> fetched once, VMEM-resident across grid steps.
        return pl.BlockSpec(arr.shape, lambda i: (0, 0))

    grid_spec = pltpu.PrefetchScalarGridSpec(
        num_scalar_prefetch=0,
        grid=(B // TB,),
        in_specs=[batch_spec(s), batch_spec(SLAB)]
                 + [resident_spec(w) for w in weights]
                 + [resident_spec(bpack)],
        out_specs=(batch_spec(SLAB), batch_spec(s)),
    )

    slab, decoded = pl.pallas_call(
        kernel,
        out_shape=(jax.ShapeDtypeStruct((B, SLAB), jnp.float32),
                   jax.ShapeDtypeStruct((B, s), jnp.float32)),
        grid_spec=grid_spec,
        compiler_params=pltpu.CompilerParams(dimension_semantics=("parallel",)),
    )(x, eps128, *weights, bpack)

    z = slab[:, :LATENT]
    label = slab[:, LATENT:2 * LATENT]
    return z, decoded, label


def init_linear(key, in_f, out_f):
    """PyTorch nn.Linear-style init; weight stored transposed as (in, out)."""
    kw, kb = jax.random.split(key)
    bound = 1.0 / jnp.sqrt(jnp.float32(in_f))
    w = jax.random.uniform(kw, (in_f, out_f), jnp.float32, -bound, bound)
    b = jax.random.uniform(kb, (out_f,), jnp.float32, -bound, bound)
    return w, b


class VAEPallas:
    def __init__(self, xn, yn, key):
        s = xn * yn
        s2, s4 = s // 2, s // 4
        dims = {
            "fc1": (s, s2), "fc2": (s2, s4),
            "fc31": (s4, LATENT), "fc32": (s4, LATENT),
            "fc4": (LATENT, s4), "fc5": (s4, s2), "fc61": (s2, s),
        }
        keys = jax.random.split(key, len(dims))
        self.in_size = s
        self.params = {name: init_linear(k, *d)
                       for (name, d), k in zip(dims.items(), keys)}
        self.packed = self._pack(s, s2, s4)

    def _pack(self, s, s2, s4):
        """One-time packing: merged/padded head, padded fc4, bf16 weights,
        single 128-aligned bias buffer."""
        p = self.params
        f32, bf16 = jnp.float32, jnp.bfloat16

        w31, b31 = p["fc31"]
        w32, b32 = p["fc32"]
        wh = jnp.zeros((s4, SLAB), f32)
        wh = wh.at[:, :LATENT].set(w31).at[:, LATENT:2 * LATENT].set(w32)
        bh = jnp.zeros((SLAB,), f32)
        bh = bh.at[:LATENT].set(b31).at[LATENT:2 * LATENT].set(b32)

        w4, b4 = p["fc4"]
        w4p = jnp.zeros((SLAB, s4), f32).at[:LATENT, :].set(w4)

        weights = {
            "w1": p["fc1"][0], "w2": p["fc2"][0], "wh": wh,
            "w4": w4p, "w5": p["fc5"][0], "w61": p["fc61"][0],
        }
        packed = {k: v.astype(bf16) for k, v in weights.items()}

        biases = [p["fc1"][1], p["fc2"][1], bh, b4, p["fc5"][1], p["fc61"][1]]
        offsets, segs, off = [], [], 0
        for b in biases:
            offsets.append(off)
            seg_w = _pad128(b.shape[0])
            segs.append(jnp.pad(b.astype(f32), (0, seg_w - b.shape[0])))
            off += seg_w
        packed["bpack"] = jnp.concatenate(segs).reshape(1, off)
        packed["bias_offsets"] = tuple(offsets)
        return packed

    def __call__(self, x, eps, *, batch_tile=None):
        # eps is the N(0,1) draw used by reparametrize, passed explicitly so the
        # kernel is deterministic and checkable against the reference.
        return vae_forward(self.packed, x, eps, batch_tile=batch_tile)


def _reference(params, x, eps, *, bf16_matmul):
    """Pure-JAX reference mirroring PyTorch VAE.forward."""
    def lin(h, name):
        w, b = params[name]
        if bf16_matmul:
            return jnp.dot(h.astype(jnp.bfloat16), w.astype(jnp.bfloat16),
                           preferred_element_type=jnp.float32) + b
        return h @ w + b

    h = jax.nn.relu(lin(x, "fc1"))
    h = jax.nn.relu(lin(h, "fc2"))
    mu, logvar = lin(h, "fc31"), lin(h, "fc32")
    z = eps * jnp.exp(0.5 * logvar) + mu
    label = jax.nn.softmax(z, axis=1)
    d = jax.nn.relu(lin(z, "fc4"))
    d = jax.nn.relu(lin(d, "fc5"))
    dec = jax.nn.sigmoid(lin(d, "fc61"))
    return z, dec, label


if __name__ == "__main__":
    # VAE(xn=16, yn=16) -> inSize=256; layers 256 -> 128 -> 64 -> 4 -> 64 -> 128 -> 256.
    xn, yn = 16, 16
    B = 16           # small demo batch; TB=8 -> 2 "parallel" grid steps
    TB = 8

    key = jax.random.PRNGKey(0)
    k_param, k_x, k_eps = jax.random.split(key, 3)
    model = VAEPallas(xn, yn, k_param)

    x = jax.random.uniform(k_x, (B, xn * yn), jnp.float32)
    eps = jax.random.normal(k_eps, (B, LATENT), jnp.float32)

    z, decoded, label = model(x, eps, batch_tile=TB)
    jax.block_until_ready((z, decoded, label))

    assert z.shape == (B, LATENT)
    assert decoded.shape == (B, xn * yn)
    assert label.shape == (B, LATENT)

    # Matched-precision reference (bf16 MXU inputs, f32 accumulation).
    z_m, dec_m, lab_m = _reference(model.params, x, eps, bf16_matmul=True)
    for got, ref, name in ((z, z_m, "z"), (decoded, dec_m, "decoded"), (label, lab_m, "label")):
        err = float(jnp.max(jnp.abs(got - ref)))
        assert err < 1e-2, (name, err)

    # Sanity vs pure-f32 reference (looser: absorbs bf16 matmul quantization).
    z_r, dec_r, lab_r = _reference(model.params, x, eps, bf16_matmul=False)
    for got, ref, name in ((z, z_r, "z"), (decoded, dec_r, "decoded"), (label, lab_r, "label")):
        err = float(jnp.max(jnp.abs(got - ref)))
        assert err < 8e-2, (name, err)

    print("KERNEL_OK")
</pallas_src>

<mosaic_0001>
module attributes {stable_mosaic.version = 11 : i64} {
  func.func @kernel(%arg0: i32, %arg1: memref<8x256xf32, #tpu.memory_space<vmem>>, %arg2: memref<8x128xf32, #tpu.memory_space<vmem>>, %arg3: memref<256x128xbf16, #tpu.memory_space<vmem>>, %arg4: memref<128x64xbf16, #tpu.memory_space<vmem>>, %arg5: memref<64x128xbf16, #tpu.memory_space<vmem>>, %arg6: memref<128x64xbf16, #tpu.memory_space<vmem>>, %arg7: memref<64x128xbf16, #tpu.memory_space<vmem>>, %arg8: memref<128x256xbf16, #tpu.memory_space<vmem>>, %arg9: memref<1x896xf32, #tpu.memory_space<vmem>>, %arg10: memref<8x128xf32, #tpu.memory_space<vmem>>, %arg11: memref<8x256xf32, #tpu.memory_space<vmem>>) attributes {dimension_semantics = [#tpu.dimension_semantics<parallel>], iteration_bounds = array<i64: 2>, scalar_prefetch = 0 : i64, scratch_operands = 0 : i64, tpu.core_type = #tpu.core_type<tc>, window_params = [{transform_indices = @transform_0, window_bounds = array<i64: 8, 256>}, {transform_indices = @transform_1, window_bounds = array<i64: 8, 128>}, {pipeline_mode = #tpu.pipeline_mode<synchronous>, transform_indices = @transform_2, window_bounds = array<i64: 256, 128>}, {pipeline_mode = #tpu.pipeline_mode<synchronous>, transform_indices = @transform_3, window_bounds = array<i64: 128, 64>}, {pipeline_mode = #tpu.pipeline_mode<synchronous>, transform_indices = @transform_4, window_bounds = array<i64: 64, 128>}, {pipeline_mode = #tpu.pipeline_mode<synchronous>, transform_indices = @transform_5, window_bounds = array<i64: 128, 64>}, {pipeline_mode = #tpu.pipeline_mode<synchronous>, transform_indices = @transform_6, window_bounds = array<i64: 64, 128>}, {pipeline_mode = #tpu.pipeline_mode<synchronous>, transform_indices = @transform_7, window_bounds = array<i64: 128, 256>}, {pipeline_mode = #tpu.pipeline_mode<synchronous>, transform_indices = @transform_8, window_bounds = array<i64: 1, 896>}, {transform_indices = @transform_9, window_bounds = array<i64: 8, 128>}, {transform_indices = @transform_10, window_bounds = array<i64: 8, 256>}]} {
    %c0 = arith.constant 0 : index
    %c0_0 = arith.constant 0 : index
    %0 = vector.load %arg1[%c0, %c0_0] : memref<8x256xf32, #tpu.memory_space<vmem>>, vector<8x256xf32>
    %1 = arith.truncf %0 : vector<8x256xf32> to vector<8x256xbf16>
    %c0_1 = arith.constant 0 : index
    %c0_2 = arith.constant 0 : index
    %2 = vector.load %arg3[%c0_1, %c0_2] : memref<256x128xbf16, #tpu.memory_space<vmem>>, vector<256x128xbf16>
    %cst = arith.constant dense<0.000000e+00> : vector<8x128xf32>
    %3 = tpu.matmul %1, %2, %cst {dimension_numbers = #tpu.dot_dimension_numbers<[1], [0], [0], [1], [0, 0, 1, 1], [], []>} : vector<8x256xbf16>, vector<256x128xbf16>, vector<8x128xf32> -> vector<8x128xf32>
    %c0_3 = arith.constant 0 : index
    %c0_4 = arith.constant 0 : index
    %4 = vector.load %arg9[%c0_3, %c0_4] : memref<1x896xf32, #tpu.memory_space<vmem>>, vector<1x128xf32>
    %5 = vector.broadcast %4 : vector<1x128xf32> to vector<8x128xf32>
    %6 = arith.addf %3, %5 : vector<8x128xf32>
    %cst_5 = arith.constant 0.000000e+00 : f32
    %7 = vector.broadcast %cst_5 : f32 to vector<8x128xf32>
    %8 = arith.maximumf %6, %7 : vector<8x128xf32>
    %9 = arith.truncf %8 : vector<8x128xf32> to vector<8x128xbf16>
    %c0_6 = arith.constant 0 : index
    %c0_7 = arith.constant 0 : index
    %10 = vector.load %arg4[%c0_6, %c0_7] : memref<128x64xbf16, #tpu.memory_space<vmem>>, vector<128x64xbf16>
    %cst_8 = arith.constant dense<0.000000e+00> : vector<8x64xf32>
    %11 = tpu.matmul %9, %10, %cst_8 {dimension_numbers = #tpu.dot_dimension_numbers<[1], [0], [0], [1], [0, 0, 1, 1], [], []>} : vector<8x128xbf16>, vector<128x64xbf16>, vector<8x64xf32> -> vector<8x64xf32>
    %c0_9 = arith.constant 0 : index
    %c128 = arith.constant 128 : index
    %12 = vector.load %arg9[%c0_9, %c128] : memref<1x896xf32, #tpu.memory_space<vmem>>, vector<1x64xf32>
    %13 = vector.broadcast %12 : vector<1x64xf32> to vector<8x64xf32>
    %14 = arith.addf %11, %13 : vector<8x64xf32>
    %cst_10 = arith.constant 0.000000e+00 : f32
    %15 = vector.broadcast %cst_10 : f32 to vector<8x64xf32>
    %16 = arith.maximumf %14, %15 : vector<8x64xf32>
    %17 = arith.truncf %16 : vector<8x64xf32> to vector<8x64xbf16>
    %c0_11 = arith.constant 0 : index
    %c0_12 = arith.constant 0 : index
    %18 = vector.load %arg5[%c0_11, %c0_12] : memref<64x128xbf16, #tpu.memory_space<vmem>>, vector<64x128xbf16>
    %cst_13 = arith.constant dense<0.000000e+00> : vector<8x128xf32>
    %19 = tpu.matmul %17, %18, %cst_13 {dimension_numbers = #tpu.dot_dimension_numbers<[1], [0], [0], [1], [0, 0, 1, 1], [], []>} : vector<8x64xbf16>, vector<64x128xbf16>, vector<8x128xf32> -> vector<8x128xf32>
    %c0_14 = arith.constant 0 : index
    %c256 = arith.constant 256 : index
    %20 = vector.load %arg9[%c0_14, %c256] : memref<1x896xf32, #tpu.memory_space<vmem>>, vector<1x128xf32>
    %21 = vector.broadcast %20 : vector<1x128xf32> to vector<8x128xf32>
    %22 = arith.addf %19, %21 : vector<8x128xf32>
    %23 = tpu.iota {dimensions = array<i32: 1>} : vector<8x128xi32>
    %c4_i32 = arith.constant 4 : i32
    %24 = vector.broadcast %c4_i32 : i32 to vector<8x128xi32>
    %25 = arith.cmpi slt, %23, %24 : vector<8x128xi32>
    %cst_15 = arith.constant 0.000000e+00 : f32
    %26 = vector.broadcast %cst_15 : f32 to vector<8x128xf32>
    %27 = arith.select %25, %22, %26 : vector<8x128xi1>, vector<8x128xf32>
    %c124_i32 = arith.constant 124 : i32
    %28 = tpu.dynamic_rotate %22 by %c124_i32 dim 1 : vector<8x128xf32>, i32 -> vector<8x128xf32>
    %c0_16 = arith.constant 0 : index
    %c0_17 = arith.constant 0 : index
    %29 = vector.load %arg2[%c0_16, %c0_17] : memref<8x128xf32, #tpu.memory_space<vmem>>, vector<8x128xf32>
    %cst_18 = arith.constant 5.000000e-01 : f32
    %30 = vector.broadcast %cst_18 : f32 to vector<8x128xf32>
    %31 = arith.mulf %30, %28 : vector<8x128xf32>
    %32 = math.exp %31 : vector<8x128xf32>
    %33 = arith.mulf %29, %32 : vector<8x128xf32>
    %34 = arith.addf %33, %27 : vector<8x128xf32>
    %cst_19 = arith.constant 0xFF800000 : f32
    %35 = vector.broadcast %cst_19 : f32 to vector<8x128xf32>
    %36 = arith.select %25, %34, %35 : vector<8x128xi1>, vector<8x128xf32>
    %cst_20 = arith.constant dense<0xFF800000> : vector<8xf32>
    %37 = vector.multi_reduction <maximumf>, %36, %cst_20 [1] : vector<8x128xf32> to vector<8xf32>
    %38 = vector.shape_cast %37 : vector<8xf32> to vector<8x1xf32>
    %39 = vector.broadcast %38 : vector<8x1xf32> to vector<8x128xf32>
    %40 = arith.subf %34, %39 : vector<8x128xf32>
    %41 = math.exp %40 : vector<8x128xf32>
    %cst_21 = arith.constant 0.000000e+00 : f32
    %42 = vector.broadcast %cst_21 : f32 to vector<8x128xf32>
    %43 = arith.select %25, %41, %42 : vector<8x128xi1>, vector<8x128xf32>
    %cst_22 = arith.constant dense<0.000000e+00> : vector<8xf32>
    %44 = vector.multi_reduction <add>, %43, %cst_22 [1] : vector<8x128xf32> to vector<8xf32>
    %45 = vector.shape_cast %44 : vector<8xf32> to vector<8x1xf32>
    %46 = tpu.reciprocal %45 {approx = true} : vector<8x1xf32> -> vector<8x1xf32>
    %47 = vector.broadcast %46 : vector<8x1xf32> to vector<8x128xf32>
    %48 = arith.mulf %43, %47 : vector<8x128xf32>
    %c4_i32_23 = arith.constant 4 : i32
    %49 = tpu.dynamic_rotate %48 by %c4_i32_23 dim 1 : vector<8x128xf32>, i32 -> vector<8x128xf32>
    %50 = arith.addf %34, %49 : vector<8x128xf32>
    %c0_24 = arith.constant 0 : index
    %c0_25 = arith.constant 0 : index
    %51 = vector.load %arg10[%c0_24, %c0_25] : memref<8x128xf32, #tpu.memory_space<vmem>>, vector<8x128xf32>
    tpu.vector_store %arg10[%c0_24, %c0_25], %50 {strides = array<i32>} : memref<8x128xf32, #tpu.memory_space<vmem>>, vector<8x128xf32>,
    %52 = arith.truncf %34 : vector<8x128xf32> to vector<8x128xbf16>
    %c0_26 = arith.constant 0 : index
    %c0_27 = arith.constant 0 : index
    %53 = vector.load %arg6[%c0_26, %c0_27] : memref<128x64xbf16, #tpu.memory_space<vmem>>, vector<128x64xbf16>
    %cst_28 = arith.constant dense<0.000000e+00> : vector<8x64xf32>
    %54 = tpu.matmul %52, %53, %cst_28 {dimension_numbers = #tpu.dot_dimension_numbers<[1], [0], [0], [1], [0, 0, 1, 1], [], []>} : vector<8x128xbf16>, vector<128x64xbf16>, vector<8x64xf32> -> vector<8x64xf32>
    %c0_29 = arith.constant 0 : index
    %c384 = arith.constant 384 : index
    %55 = vector.load %arg9[%c0_29, %c384] : memref<1x896xf32, #tpu.memory_space<vmem>>, vector<1x64xf32>
    %56 = vector.broadcast %55 : vector<1x64xf32> to vector<8x64xf32>
    %57 = arith.addf %54, %56 : vector<8x64xf32>
    %cst_30 = arith.constant 0.000000e+00 : f32
    %58 = vector.broadcast %cst_30 : f32 to vector<8x64xf32>
    %59 = arith.maximumf %57, %58 : vector<8x64xf32>
    %60 = arith.truncf %59 : vector<8x64xf32> to vector<8x64xbf16>
    %c0_31 = arith.constant 0 : index
    %c0_32 = arith.constant 0 : index
    %61 = vector.load %arg7[%c0_31, %c0_32] : memref<64x128xbf16, #tpu.memory_space<vmem>>, vector<64x128xbf16>
    %cst_33 = arith.constant dense<0.000000e+00> : vector<8x128xf32>
    %62 = tpu.matmul %60, %61, %cst_33 {dimension_numbers = #tpu.dot_dimension_numbers<[1], [0], [0], [1], [0, 0, 1, 1], [], []>} : vector<8x64xbf16>, vector<64x128xbf16>, vector<8x128xf32> -> vector<8x128xf32>
    %c0_34 = arith.constant 0 : index
    %c512 = arith.constant 512 : index
    %63 = vector.load %arg9[%c0_34, %c512] : memref<1x896xf32, #tpu.memory_space<vmem>>, vector<1x128xf32>
    %64 = vector.broadcast %63 : vector<1x128xf32> to vector<8x128xf32>
    %65 = arith.addf %62, %64 : vector<8x128xf32>
    %cst_35 = arith.constant 0.000000e+00 : f32
    %66 = vector.broadcast %cst_35 : f32 to vector<8x128xf32>
    %67 = arith.maximumf %65, %66 : vector<8x128xf32>
    %68 = arith.truncf %67 : vector<8x128xf32> to vector<8x128xbf16>
    %c0_36 = arith.constant 0 : index
    %c0_37 = arith.constant 0 : index
    %69 = vector.load %arg8[%c0_36, %c0_37] : memref<128x256xbf16, #tpu.memory_space<vmem>>, vector<128x256xbf16>
    %cst_38 = arith.constant dense<0.000000e+00> : vector<8x256xf32>
    %70 = tpu.matmul %68, %69, %cst_38 {dimension_numbers = #tpu.dot_dimension_numbers<[1], [0], [0], [1], [0, 0, 1, 1], [], []>} : vector<8x128xbf16>, vector<128x256xbf16>, vector<8x256xf32> -> vector<8x256xf32>
    %c0_39 = arith.constant 0 : index
    %c640 = arith.constant 640 : index
    %71 = vector.load %arg9[%c0_39, %c640] : memref<1x896xf32, #tpu.memory_space<vmem>>, vector<1x256xf32>
    %72 = vector.broadcast %71 : vector<1x256xf32> to vector<8x256xf32>
    %73 = arith.addf %70, %72 : vector<8x256xf32>
    %74 = arith.negf %73 : vector<8x256xf32>
    %75 = math.exp %74 : vector<8x256xf32>
    %cst_40 = arith.constant 1.000000e+00 : f32
    %76 = vector.broadcast %cst_40 : f32 to vector<8x256xf32>
    %77 = arith.addf %76, %75 : vector<8x256xf32>
    %78 = arith.divf %76, %77 : vector<8x256xf32>
    %c0_41 = arith.constant 0 : index
    %c0_42 = arith.constant 0 : index
    %79 = vector.load %arg11[%c0_41, %c0_42] : memref<8x256xf32, #tpu.memory_space<vmem>>, vector<8x256xf32>
    tpu.vector_store %arg11[%c0_41, %c0_42], %78 {strides = array<i32>} : memref<8x256xf32, #tpu.memory_space<vmem>>, vector<8x256xf32>,
    return
  }
  func.func @transform_0(%arg0: i32) -> (i32, i32) {
    %c0_i32 = arith.constant 0 : i32
    %c0_i32_0 = arith.constant 0 : i32
    return %arg0, %c0_i32 : i32, i32
  }
  func.func @transform_1(%arg0: i32) -> (i32, i32) {
    %c0_i32 = arith.constant 0 : i32
    %c0_i32_0 = arith.constant 0 : i32
    return %arg0, %c0_i32 : i32, i32
  }
  func.func @transform_2(%arg0: i32) -> (i32, i32) {
    %c0_i32 = arith.constant 0 : i32
    %c0_i32_0 = arith.constant 0 : i32
    %c0_i32_1 = arith.constant 0 : i32
    return %c0_i32, %c0_i32_0 : i32, i32
  }
  func.func @transform_3(%arg0: i32) -> (i32, i32) {
    %c0_i32 = arith.constant 0 : i32
    %c0_i32_0 = arith.constant 0 : i32
    %c0_i32_1 = arith.constant 0 : i32
    return %c0_i32, %c0_i32_0 : i32, i32
  }
  func.func @transform_4(%arg0: i32) -> (i32, i32) {
    %c0_i32 = arith.constant 0 : i32
    %c0_i32_0 = arith.constant 0 : i32
    %c0_i32_1 = arith.constant 0 : i32
    return %c0_i32, %c0_i32_0 : i32, i32
  }
  func.func @transform_5(%arg0: i32) -> (i32, i32) {
    %c0_i32 = arith.constant 0 : i32
    %c0_i32_0 = arith.constant 0 : i32
    %c0_i32_1 = arith.constant 0 : i32
    return %c0_i32, %c0_i32_0 : i32, i32
  }
  func.func @transform_6(%arg0: i32) -> (i32, i32) {
    %c0_i32 = arith.constant 0 : i32
    %c0_i32_0 = arith.constant 0 : i32
    %c0_i32_1 = arith.constant 0 : i32
    return %c0_i32, %c0_i32_0 : i32, i32
  }
  func.func @transform_7(%arg0: i32) -> (i32, i32) {
    %c0_i32 = arith.constant 0 : i32
    %c0_i32_0 = arith.constant 0 : i32
    %c0_i32_1 = arith.constant 0 : i32
    return %c0_i32, %c0_i32_0 : i32, i32
  }
  func.func @transform_8(%arg0: i32) -> (i32, i32) {
    %c0_i32 = arith.constant 0 : i32
    %c0_i32_0 = arith.constant 0 : i32
    %c0_i32_1 = arith.constant 0 : i32
    return %c0_i32, %c0_i32_0 : i32, i32
  }
  func.func @transform_9(%arg0: i32) -> (i32, i32) {
    %c0_i32 = arith.constant 0 : i32
    %c0_i32_0 = arith.constant 0 : i32
    return %arg0, %c0_i32 : i32, i32
  }
  func.func @transform_10(%arg0: i32) -> (i32, i32) {
    %c0_i32 = arith.constant 0 : i32
    %c0_i32_0 = arith.constant 0 : i32
    return %arg0, %c0_i32 : i32, i32
  }
}

</mosaic_0001>

<bundles_post_ra>
// kernel: tpu_custom_call.1
= control target key start
LH: loop header
LB: loop body
LE: loop exit
PB: predicated region body
PF: predicated region fallthrough
CT: control target
= control target key end

     0   :  { %s2509_s0 = inlined_call_operand.vmem [shape: f32[16,256], index: 0, kind: input, shape index: {}]   ;;  %s2510_s1 = inlined_call_operand.hbm [shape: f32[16,128], index: 1, kind: input, shape index: {}]   ;;  %s2511_s2 = inlined_call_operand.vmem [shape: bf16[256,128], index: 2, kind: input, shape index: {}]   ;;  %s2512_s3 = inlined_call_operand.vmem [shape: bf16[128,64], index: 3, kind: input, shape index: {}]   ;;  %s2513_s4 = inlined_call_operand.hbm [shape: bf16[64,128], index: 4, kind: input, shape index: {}]   ;;  %s2514_s5 = inlined_call_operand.vmem [shape: bf16[128,64], index: 5, kind: input, shape index: {}]   ;;  %s2515_s6 = inlined_call_operand.hbm [shape: bf16[64,128], index: 6, kind: input, shape index: {}]   ;;  %s2516_s7 = inlined_call_operand.hbm [shape: bf16[128,256], index: 7, kind: input, shape index: {}]   ;;  %s2517_s8 = inlined_call_operand.vmem [shape: f32[1,896], index: 8, kind: input, shape index: {}]   ;;  %s2518_s9 = inlined_call_operand.hbm [shape: f32[16,128], index: 9, kind: output, shape index: {0}]   ;;  %s2519_s10 = inlined_call_operand.hbm [shape: f32[16,256], index: 10, kind: output, shape index: {1}]  }
   0x1   :  { %2528 = sst [smem:[#allocation20_spill]] %s2518_s9 }
   0x2   :  { %2529 = sst [smem:[#allocation21_spill]] %s2519_s10 }
   0x3   :  { %16 = vsyncpa [#allocation3], 0 }
   0x4   :  { %18 = vsyncpa [#allocation3 + $0x1], 0 }
   0x5   :  { %19 = vsyncpa [#allocation6], 0 }
   0x6   :  { %20 = vsyncpa [#allocation9], 0 }
   0x7   :  { %21 = vsyncpa [#allocation4], 0 }
   0x8   :  { %23 = vsyncpa [#allocation4 + $0x1], 0 }
   0x9   :  { %24 = vsyncpa [#allocation12], 0 }
   0xa   :  { %26 = vsyncpa [#allocation12 + $0x1], 0  ;;  %s2058_s13 = smov 0   ;;  %s2060_s14 = smov 0  }
   0xb   :  { %s2062_s15 = smov 0   ;;  %s2064_s16 = smov 0  }
   0xc LB: > { %2530 = sst [smem:[#allocation18_spill]] %s1974_s13  ;;  %s2079_s17 = sadd.s32 4294967295, %s1986_s16   ;;  %s1986_s16 = sphi %s2064_s16, %s2556_s16   ;;  %s1982_s15 = sphi %s2062_s15, %s2555_s15   ;;  %s1978_s14 = sphi %s2060_s14, %s2554_s14   ;;  %s1974_s13 = sphi %s2058_s13, %s2553_s13  }
   0xd   : > { %s1392_s18 = sadd.s32 4294967294, %s1986_s16   ;;  %p78_p0 = scmp.ne.s32.totalorder %s1978_s14, %s1974_s13 }
   0xe   : > { %p2520_p1 = scmp.eq.s32.totalorder %s2079_s17, 0  ;;  %p255_p3 = scmp.eq.s32.totalorder %s1392_s18, 1 }
   0xf   : > { %p1393_p5 = scmp.ge.s32.totalorder %s1986_s16, 1  ;;  %p288_p7 = scmp.lt.s32.totalorder %s1986_s16, 3 }
  0x10   : > { %p2088_p4 = por %p2520_p1, %p78_p0  ;;  %p2093_p6 = por %p255_p3, %p78_p0 }
  0x11   : > { %p2098_p8 = pnand %p1393_p5, %p288_p7  ;;  %s1988_s22 = smov [#allocation5]  }
  0x12   : > { %s2531_s19 = scalar_select %p2088_p4, 1, 0 }
  0x13   : > { %s2532_s20 = scalar_select %p2093_p6, 1, 0 }
  0x14   : > { %s2534_s21 = scalar_select %p2098_p8, 1, 0 }
  0x15   : > { %2533 = sst [smem:[#allocation19_spill]] %s2532_s20  ;;  %s306_s23 = sshll.u32 %s1988_s22, 4  ;;  %s2102_s23 = int_to_ptr.vmem [resolvable:$true] %s306_s23 }
  0x16   : > { %p1615_p9 = pneg %p2098_p8  ;;  %s1989_s25 = smov [#allocation7]  }
  0x17   : > { %s322_s26 = sshll.u32 %s1989_s25, 4  ;;  %s1990_s27 = smov [#allocation8]   ;;  %s2113_s26 = int_to_ptr.vmem [resolvable:$true] %s322_s26 }
  0x18   : > { %p2109_p11 = pnand %p1615_p9, %p2520_p1  ;;  %s2115_s28 = sshll.u32 %s1990_s27, 4  ;;  %s336_s28 = int_to_ptr.vmem [resolvable:$true] %s2115_s28 }
  0x19   : > { %s1766_s11 = scalar_lea.hbm %s2513_s4, 512 }
  0x1a   : > { %p1767_p12 = scmp.ne.s32.totalorder %s2513_s4, %s1766_s11  ;;  %p2125_p13 = pneg %p2109_p11 }
  0x1b   : > { %p1773_p5 = scmp.lt.u32.totalorder %s1766_s11, %s2513_s4 }
  0x1c   : > { %p1769_p0 = pnand %p2125_p13, %p1767_p12 }
  0x1e   : > { %p1770_p3 = pneg %p1769_p0 }
  0x20   : > { %p1775_p7 = pnand %p1773_p5, %p1770_p3 }
  0x22   : > { %1778 = shalt.err (!%p1775_p7)
}
  0x23   : > { %s1779_s29 = scalar_lea.vmem %s2102_s23, 512  ;;  %p1787_p2 = scmp.lt.s32.totalorder %s2102_s23, %s2102_s23 }
  0x24   : > { %p1780_p9 = scmp.ne.s32.totalorder %s2102_s23, %s1779_s29  ;;  %p1788_p6 = scmp.lt.s32.totalorder %s1779_s29, %s1779_s29 }
  0x26   : > { %p1782_p10 = pnand %p1780_p9, %p2125_p13  ;;  %p1789_p12 = por %p1788_p6, %p1787_p2 }
  0x28   : > { %p1783_p1 = pneg %p1782_p10 }
  0x2a   : > { %p1790_p0 = pnand %p1789_p12, %p1783_p1 }
  0x2c   : > { %1793 = shalt.err (!%p1790_p0)
}
  0x2d   : > { %s1991_s30 = smov 64   ;;  %s1992_s11 = smov 4  }
  0x2e   : > { %1618 = dma.hbm_to_vmem [thread:$0]  (!%p2109_p11), %s2513_s4, 512, %s2102_s23, [#allocation6], %s1991_s30, %s1991_s30, %s1992_s11  }
  0x2f   : > { %s1794_s20 = scalar_lea.hbm %s2515_s6, 512 }
  0x30   : > { %p1795_p2 = scmp.ne.s32.totalorder %s2515_s6, %s1794_s20  ;;  %p1801_p10 = scmp.lt.u32.totalorder %s1794_s20, %s2515_s6 }
  0x32   : > { %p1797_p1 = pnand %p1795_p2, %p2125_p13 }
  0x34   : > { %p1798_p6 = pneg %p1797_p1 }
  0x36   : > { %p1803_p3 = pnand %p1801_p10, %p1798_p6 }
  0x38   : > { %1806 = shalt.err (!%p1803_p3)
}
  0x39   : > { %s1807_s23 = scalar_lea.vmem %s2113_s26, 512  ;;  %p1815_p12 = scmp.lt.s32.totalorder %s2113_s26, %s2113_s26 }
  0x3a   : > { %p1808_p5 = scmp.ne.s32.totalorder %s2113_s26, %s1807_s23  ;;  %p1816_p0 = scmp.lt.s32.totalorder %s1807_s23, %s1807_s23 }
  0x3c   : > { %p1810_p7 = pnand %p1808_p5, %p2125_p13  ;;  %p1817_p2 = por %p1816_p0, %p1815_p12 }
  0x3e   : > { %p1811_p9 = pneg %p1810_p7 }
  0x40   : > { %p1818_p1 = pnand %p1817_p2, %p1811_p9 }
  0x42   : > { %1821 = shalt.err (!%p1818_p1)
}
  0x43   : > { %1621 = dma.hbm_to_vmem [thread:$0]  (!%p2109_p11), %s2515_s6, 512, %s2113_s26, [#allocation6], %s1991_s30, %s1991_s30, %s1992_s11  }
  0x44   : > { %s1822_s12 = scalar_lea.hbm %s2516_s7, 2048 }
  0x45   : > { %p1823_p6 = scmp.ne.s32.totalorder %s2516_s7, %s1822_s12  ;;  %p1829_p5 = scmp.lt.u32.totalorder %s1822_s12, %s2516_s7 }
  0x47   : > { %p1825_p10 = pnand %p1823_p6, %p2125_p13 }
  0x49   : > { %p1826_p3 = pneg %p1825_p10 }
  0x4b   : > { %p1831_p7 = pnand %p1829_p5, %p1826_p3 }
  0x4d   : > { %1834 = shalt.err (!%p1831_p7)
}
  0x4e   : > { %s1835_s23 = scalar_lea.vmem %s336_s28, 2048  ;;  %p1843_p2 = scmp.lt.s32.totalorder %s336_s28, %s336_s28 }
  0x4f   : > { %p1836_p9 = scmp.ne.s32.totalorder %s336_s28, %s1835_s23  ;;  %p1844_p1 = scmp.lt.s32.totalorder %s1835_s23, %s1835_s23 }
  0x51   : > { %p1838_p12 = pnand %p1836_p9, %p2125_p13  ;;  %p1845_p4 = por %p1844_p1, %p1843_p2 }
  0x53   : > { %p1839_p0 = pneg %p1838_p12 }
  0x55   : > { %p1846_p8 = pnand %p1845_p4, %p1839_p0 }
  0x57   : > { %1849 = shalt.err (!%p1846_p8)
}
  0x58   : > { %s1993_s26 = smov 128   ;;  %s1994_s22 = smov 8  }
  0x59   : > { %1624 = dma.hbm_to_vmem [thread:$0]  (!%p2109_p11), %s2516_s7, 2048, %s336_s28, [#allocation9], %s1993_s26, %s1993_s26, %s1994_s22  }
  0x5a   : > { %s2189_s9 = sadd.s32 1, %s1986_s16   ;;  %s65_s13 = sadd.s32 1, %s1982_s15 }
  0x5b   : > { %s62_s10 = ssub.s32 %s1986_s16, %s2189_s9  ;;  %p72_p8 = scmp.ne.s32.totalorder %s1982_s15, %s1978_s14 }
  0x5c   : > { %p63_p4 = scmp.eq.s32.totalorder %s62_s10, 0  ;;  %p73_p13 = scmp.eq.s32.totalorder %s1986_s16, 0 }
  0x5d   : > { %p1639_p6 = scmp.lt.s32.totalorder %s1986_s16, 2  ;;  %p2537_p3 = scmp.eq.s32.totalorder %s2079_s17, 1 }
  0x5e   : > { %s2199_s20 = scalar_select %p63_p4, %s1982_s15, %s65_s13  }
  0x5f   : > { %p74_p10 = por %p73_p13, %p72_p8  ;;  %p2203_p5 = por %p2537_p3, %p72_p8 }
  0x60   : > { %s360_s24 = sand.u32 1, %s1982_s15   ;;  %s1399_s18 = sshll.u32 %s1986_s16, 7 }
  0x61   : > { %s1398_s28 = sshll.u32 %s360_s24, 3  ;;  %s2212_s29 = scalar_lea.hbm %s2510_s1, %s1399_s18 }
  0x62   : > { %s364_s23 = scalar_lea.vmem [#allocation2], %s1398_s28  ;;  %p2214_p11 = pnand %p1639_p6, %p74_p10 }
  0x63   : > { %s371_s26 = sshll.u32 %s364_s23, 4  ;;  %s361_s30 = scalar_lea.sflag [#allocation3], %s360_s24  ;;  %s2218_s26 = int_to_ptr.vmem [resolvable:$true] %s371_s26 }
  0x64   : > { %s1850_s11 = scalar_lea.hbm %s2212_s29, 128  ;;  %p1852_p9 = pneg %p2214_p11 }
  0x65   : > { %p1851_p7 = scmp.ne.s32.totalorder %s2212_s29, %s1850_s11  ;;  %s1855_s18 = scalar_lea.hbm %s2510_s1, 256 }
  0x66   : > { %p1856_p2 = scmp.lt.u32.totalorder %s2212_s29, %s2510_s1  ;;  %p1857_p1 = scmp.lt.u32.totalorder %s1855_s18, %s1850_s11 }
  0x67   : > { %p1853_p12 = pnand %p1852_p9, %p1851_p7  ;;  %p1859_p8 = scmp.lt.u32.totalorder %s1850_s11, %s2212_s29 }
  0x68   : > { %p1858_p4 = por %p1857_p1, %p1856_p2 }
  0x69   : > { %p1854_p0 = pneg %p1853_p12 }
  0x6a   : > { %p1860_p13 = por %p1859_p8, %p1858_p4 }
  0x6c   : > { %p1861_p6 = pnand %p1860_p13, %p1854_p0 }
  0x6e   : > { %1864 = shalt.err (!%p1861_p6)
}
  0x6f   : > { %s1865_s24 = scalar_lea.vmem %s2218_s26, 128  ;;  %s1995_s27 = smov [#allocation2]  }
  0x70   : > { %p1866_p10 = scmp.ne.s32.totalorder %s2218_s26, %s1865_s24  ;;  %s1870_s23 = sshll.u32 %s1995_s27, 4  ;;  %s1871_s23 = int_to_ptr.vmem [resolvable:$false] %s1870_s23 }
  0x71   : > { %s1872_s10 = scalar_lea.vmem %s1871_s23, 256  ;;  %p1873_p12 = scmp.lt.s32.totalorder %s2218_s26, %s1871_s23 }
  0x72   : > { %p1868_p3 = pnand %p1866_p10, %p1852_p9  ;;  %p1874_p2 = scmp.lt.s32.totalorder %s1872_s10, %s1865_s24 }
  0x74   : > { %p1869_p7 = pneg %p1868_p3  ;;  %p1875_p1 = por %p1874_p2, %p1873_p12 }
  0x76   : > { %p1876_p4 = pnand %p1875_p1, %p1869_p7 }
  0x78   : > { %1879 = shalt.err (!%p1876_p4)
}
  0x79   : > { %1628 = dma.hbm_to_vmem [thread:$0]  (!%p2214_p11), %s2212_s29, 128, %s2218_s26, %s361_s30  }
  0x7a   : > { %p2540_p0 = scmp.ne.s32.totalorder %s2534_s21, 0 }
  0x7b   : > { %s2248_s11 = sand.u32 (!%p2540_p0), 1, %s1978_s14   ;;  %p2541_p9 = scmp.ne.s32.totalorder (!%p2540_p0), %s2531_s19, 0 }
  0x7c   : > { %380 = sbr.rel (%p2540_p0) target bundleno = 1652 (0x674), region = 56  ;;  %s2527_s13 = sshll.u32 (!%p2540_p0), %s2248_s11, 3 }
  0x7d   : > { %s383_s18 = scalar_lea.sflag (!%p2540_p0), [#allocation3], %s2248_s11  ;;  %s2254_s28 = scalar_lea.vmem (!%p2540_p0), [#allocation2], %s2527_s13 }
  0x83   : > { %1953 = dma.done.wait (%p2541_p9), %s383_s18, 128  }
  0x84   : > { %1955 = vsyncadd (%p2541_p9), %s383_s18, 4294967168  ;;  %p2542_p11 = scmp.eq.s32.totalorder %s2079_s17, 0 }
  0x86   : > { %1957 = dma.done.wait (%p2542_p11), [#allocation6], 1024   ;;  %p2543_p8 = pmov %p2542_p11 }
  0x88   : > { %1959 = vsyncadd (%p2543_p8), [#allocation6], 4294966272  ;;  %p2544_p13 = pmov %p2543_p8 }
  0x89   : > { %p2545_p6 = pmov %p2543_p8 }
  0x8a   : > { %1961 = dma.done.wait (%p2544_p13), [#allocation9], 2048  }
  0x8b   : > { %1963 = vsyncadd (%p2545_p6), [#allocation9], 4294965248  ;;  %v1996_v0 = vmov 0.0   ;;  %v1688_v1 = vld [vmem:[%s2511_s2 + $0x40] sm:$0xff]   ;;  %v1690_v3 = vld [vmem:[%s2511_s2 + $0x48] sm:$0xff]   ;;  %p445_p10 = scmp.lt.s32.totalorder %s2079_s17, 1 }
  0x8c   : > { %1533 = vmatprep.subr.bf16.mxu1 %v1996_v0  ;;  %v1689_v2 = vld [vmem:[%s2511_s2] sm:$0xff]   ;;  %1483 = vmatprep.subr.bf16.mxu0 %v1688_v1  ;;  %v1691_v4 = vld [vmem:[%s2511_s2 + $0x8] sm:$0xff]   ;;  %v1692_v5 = vld [vmem:[%s2511_s2 + $0x50] sm:$0xff]   ;;  %vm1997_vm0 = vmmov 0   ;;  %vm784_vm1 = vcmask 523264   ;;  %s2000_s19 = smov 4  }
  0x8d   : > { %1484 = vmatpush3.bf16.msra.mxu0 %v1689_v2  ;;  %s446_s10 = scalar_select %p445_p10, %s2079_s17, 1  ;;  %v1693_v6 = vld [vmem:[%s2511_s2 + $0x10] sm:$0xff]   ;;  %v1694_v7 = vld [vmem:[%s2511_s2 + $0x58] sm:$0xff]   ;;  %v1696_v9 = vld [vmem:[%s2511_s2 + $0x60] sm:$0xff]   ;;  %1549 = vmatprep.mubr.msk.bf16.mxu1 %vm1997_vm0, %v1996_v0 }
  0x8e   : > { %1485 = vmatprep.subr.bf16.mxu0 %v1690_v3  ;;  %v1695_v8 = vld [vmem:[%s2511_s2 + $0x18] sm:$0xff]   ;;  %v1697_v10 = vld [vmem:[%s2511_s2 + $0x20] sm:$0xff]   ;;  %v1698_v11 = vld [vmem:[%s2511_s2 + $0x68] sm:$0xff]   ;;  %s2546_s30 = sshll.u32 %s2248_s11, 3  ;;  %s2547_s27 = sld [smem:[#allocation20_spill]] }
  0x8f   : > { %s1481_s26 = sshll.u32 %s446_s10, 4  ;;  %v1704_v14 = vld [vmem:[%s2512_s3] sm:$0xff]   ;;  %v1699_v15 = vld [vmem:[%s2511_s2 + $0x28] sm:$0xff]   ;;  %v1700_v16 = vld [vmem:[%s2511_s2 + $0x70] sm:$0xff]   ;;  %s437_s25 = scalar_lea.vmem [#allocation10], %s2546_s30 }
  0x90   : > { %s449_s18 = scalar_lea.vmem %s2509_s0, %s1481_s26  ;;  %1534 = vmatpush3.bf16.msra.mxu1 %v1704_v14  ;;  %v1705_v17 = vld [vmem:[%s2512_s3 + $0x8] sm:$0xff]   ;;  %v1701_v18 = vld [vmem:[%s2511_s2 + $0x30] sm:$0xff]   ;;  %v1702_v19 = vld [vmem:[%s2511_s2 + $0x78] sm:$0xff]   ;;  %s1476_s26 = sshll.u32 %s2079_s17, 7 }
  0x91   : > { %1486 = vmatpush3.bf16.msra.mxu0 %v1691_v4  ;;  %v452_v12 = vld [vmem:[%s449_s18 + $0x8] sm:$0xff]  ;;  %1535 = vmatprep.subr.bf16.mxu1 %v1996_v0  ;;  %v1706_v20 = vld [vmem:[%s2512_s3 + $0x10] sm:$0xff]   ;;  %v1703_v21 = vld [vmem:[%s2511_s2 + $0x38] sm:$0xff]   ;;  %v828_v4 = vlaneseq  ;;  %s1235_s23 = sshll.u32 %s437_s25, 4  ;;  %s1217_s21 = scalar_lea.sflag [#allocation4], %s2248_s11  ;;  %s1236_s23 = int_to_ptr.vmem [resolvable:$true] %s1235_s23 }
  0x92   : > { %1487 = vmatprep.subr.bf16.mxu0 %v1692_v5  ;;  %v454_v13 = vpack.c.bf16 %v452_v12, %v452_v12  ;;  %v451_v22 = vld [vmem:[%s449_s18] sm:$0xff]  ;;  %v1707_v23 = vld [vmem:[%s2512_s3 + $0x18] sm:$0xff]   ;;  %v1709_v26 = vld [vmem:[%s2512_s3 + $0x28] sm:$0xff]   ;;  %s1998_s18 = smov 124   ;;  %s2001_s10 = smov [#allocation10]  }
  0x93   : > { %v453_v24 = vpack.c.bf16 %v451_v22, %v451_v22  ;;  %v1708_v25 = vld [vmem:[%s2512_s3 + $0x20] sm:$0xff]   ;;  %v1710_v27 = vld [vmem:[%s2512_s3 + $0x30] sm:$0xff]   ;;  %v1711_v28 = vld [vmem:[%s2512_s3 + $0x38] sm:$0xff]   ;;  %v829_v5 = vand.u32 127, %v828_v4 }
  0x94   : > { %622 = vmatprep.mubr.bf16.mxu0 %v454_v13  ;;  %1536 = vmatpush3.bf16.msra.mxu1 %v1705_v17  ;;  %v1409_v30 = vld [vmem:[%s2517_s8] ss:$0 sm:$0xff]  ;;  %v1712_v37 = vld [vmem:[#allocation5] sm:$0xff]   ;;  %v1713_v39 = vld [vmem:[#allocation5 + $0x8] sm:$0xff]  }
  0x95   : > { %1488 = vmatpush3.bf16.msra.mxu0 %v1693_v6  ;;  %1537 = vmatprep.subr.bf16.mxu1 %v1996_v0  ;;  %v1714_v40 = vld [vmem:[#allocation5 + $0x10] sm:$0xff]   ;;  %v1715_v41 = vld [vmem:[#allocation5 + $0x18] sm:$0xff]   ;;  %v1718_v52 = vld [vmem:[%s2514_s5 + $0x10] sm:$0xff]   ;;  %vm830_vm2 = vcmp.lt.s32.totalorder %v829_v5, 4 }
  0x96   : > { %1489 = vmatprep.subr.bf16.mxu0 %v1694_v7  ;;  %v1426_v42 = vld [vmem:[%s2517_s8 + $0x1] ss:$0 sm:$0xff]  ;;  %v1717_v51 = vld [vmem:[%s2514_s5 + $0x8] sm:$0xff]   ;;  %v1719_v53 = vld [vmem:[%s2514_s5 + $0x18] sm:$0xff]  }
  0x97   : > { %v1716_v50 = vld [vmem:[%s2514_s5] sm:$0xff]   ;;  %v1721_v55 = vld [vmem:[%s2514_s5 + $0x28] sm:$0xff]   ;;  %v1722_v58 = vld [vmem:[%s2514_s5 + $0x30] sm:$0xff]  }
  0x98   : > { %1538 = vmatpush3.bf16.msra.mxu1 %v1706_v20  ;;  %v1720_v54 = vld [vmem:[%s2514_s5 + $0x20] sm:$0xff]   ;;  %v1723_v63 = vld [vmem:[%s2514_s5 + $0x38] sm:$0xff]   ;;  %v1724_v13 = vld [vmem:[#allocation7] sm:$0xff]  }
  0x99   : > { %1490 = vmatpush3.bf16.msra.mxu0 %v1695_v8  ;;  %1539 = vmatprep.subr.bf16.mxu1 %v1996_v0  ;;  %v1435_v56 = vld [vmem:[%s2517_s8 + $0x2] ss:$0 sm:$0xff]  ;;  %v1725_v14 = vld [vmem:[#allocation7 + $0x8] sm:$0xff]  }
  0x9a   : > { %1491 = vmatprep.subr.bf16.mxu0 %v1696_v9  ;;  %v834_v6 = vld [vmem:[%s2254_s28] sm:$0xff]  ;;  %v1730_v22 = vld [vmem:[#allocation8 + $0x4] ss:$8 sps:$4 sm:$0xff]   ;;  %s1880_s28 = scalar_lea.vmem %s1236_s23, 128 }
  0x9b   : > { %p1881_p3 = scmp.ne.s32.totalorder %s1236_s23, %s1880_s28 }
  0x9c   : > { %1540 = vmatpush3.bf16.msra.mxu1 %v1707_v23  ;;  %v1441_v23 = vld [vmem:[%s2517_s8 + $0x3] ss:$0 sm:$0xff] }
  0x9d   : > { %1492 = vmatpush3.bf16.msra.mxu0 %v1697_v10  ;;  %1541 = vmatprep.subr.bf16.mxu1 %v1996_v0  ;;  %p1882_p7 = pnand %p1881_p3, %p2203_p5 }
  0x9e   : > { %1493 = vmatprep.subr.bf16.mxu0 %v1698_v11 }
  0x9f   : > { %p1883_p12 = pneg %p1882_p7 }
  0xa0   : > { %1542 = vmatpush3.bf16.msra.mxu1 %v1708_v25 }
  0xa1   : > { %1494 = vmatpush3.bf16.msra.mxu0 %v1699_v15  ;;  %1543 = vmatprep.subr.bf16.mxu1 %v1996_v0  ;;  %v1726_v15 = vld [vmem:[#allocation7 + $0x10] sm:$0xff]  }
  0xa2   : > { %1495 = vmatprep.subr.bf16.mxu0 %v1700_v16  ;;  %v1727_v16 = vld [vmem:[#allocation7 + $0x18] sm:$0xff]  }
  0xa4   : > { %1544 = vmatpush3.bf16.msra.mxu1 %v1709_v26 }
  0xa5   : > { %1496 = vmatpush3.bf16.msra.mxu0 %v1701_v18  ;;  %1545 = vmatprep.subr.bf16.mxu1 %v1996_v0 }
  0xa6   : > { %1497 = vmatprep.subr.bf16.mxu0 %v1702_v19 }
  0xa8   : > { %1546 = vmatpush3.bf16.msra.mxu1 %v1710_v27 }
  0xa9   : > { %1498 = vmatpush3.bf16.msra.mxu0 %v1703_v21  ;;  %1547 = vmatprep.subr.bf16.mxu1 %v1996_v0 }
  0xaa   : > { %1585 = vmatprep.subr.bf16.mxu0 %v1996_v0 }
  0xac   : > { %623 = vmatmul.mubr.bf16.vlgmr.msra.gmra.mrb[0].mxu0 %v453_v24  ;;  %1548 = vmatpush3.bf16.msra.mxu1 %v1711_v28 }
  0xad   : > { %1553 = vmatprep.subr.bf16.mxu1 %v1996_v0  ;;  %1593 = vmatprep.mubr.msk.bf16.mxu0 %vm1997_vm0, %v1996_v0 }
  0xae   : > { %1586 = vmatpush3.bf16.msra.mxu0 %v1724_v13 }
  0xaf   : > { %1587 = vmatprep.subr.bf16.mxu0 %v1996_v0 }
  0xb2   : > { %1588 = vmatpush3.bf16.msra.mxu0 %v1725_v14 }
  0xb3   : > { %1589 = vmatprep.subr.bf16.mxu0 %v1996_v0 }
  0xb6   : > { %1590 = vmatpush3.bf16.msra.mxu0 %v1726_v15 }
  0xb7   : > { %1591 = vmatprep.subr.bf16.mxu0 %v1996_v0 }
  0xba   : > { %1592 = vmatpush3.bf16.msra.mxu0 %v1727_v16 }
  0xbb   : > { %1161 = vmatprep.subr.bf16.mxu0 %v1730_v22 }
 0x17f   : > { %v1499_v29 = vpop.f32.mrb[0].mxu0 }
 0x180   : > { %v1500_v31 = vpop.f32.mrb[1].mxu0 }
 0x181   : > { %v1501_v32 = vadd.f32 %v1500_v31, %v1499_v29  ;;  %v1502_v33 = vpop.f32.mrb[2].mxu0  ;;  %v1728_v29 = vld [vmem:[#allocation8] ss:$8 sps:$4 sm:$0xff]   ;;  %v1733_v31 = vld [vmem:[#allocation8 + $0x14] ss:$8 sps:$4 sm:$0xff]  }
 0x182   : > { %v1503_v34 = vpop.f32.mrb[3].mxu0  ;;  %v1736_v33 = vld [vmem:[#allocation8 + $0x24] ss:$8 sps:$4 sm:$0xff]  }
 0x183   : > { %v625_v35 = vadd.f32 %v1501_v32, %v1409_v30  ;;  %v1731_v32 = vld [vmem:[#allocation8 + $0x10] ss:$8 sps:$4 sm:$0xff]   ;;  %v1734_v34 = vld [vmem:[#allocation8 + $0x20] ss:$8 sps:$4 sm:$0xff]  }
 0x185   : > { %v630_v36 = vmax.f32 %v625_v35, 0.0  ;;  %v1739_v35 = vld [vmem:[#allocation8 + $0x34] ss:$8 sps:$4 sm:$0xff]  }
 0x187   : > { %v631_v38 = vpack.c.bf16 %v630_v36, %v630_v36  ;;  %v1737_v36 = vld [vmem:[#allocation8 + $0x30] ss:$8 sps:$4 sm:$0xff]  }
 0x189   : > { %1550 = vmatmul.mubr.bf16.vlgmr.msra.gmra.mrb[0].mxu1 %v631_v38  ;;  %v1740_v38 = vld [vmem:[#allocation8 + $0x40] ss:$8 sps:$4 sm:$0xff]  }
 0x18a   : > { %1554 = vmatpush3.bf16.msra.mxu1 %v1712_v37  ;;  %1561 = vmatprep.mubr.msk.bf16.mxu1 %vm1997_vm0, %v1996_v0  ;;  %v1742_v37 = vld [vmem:[#allocation8 + $0x44] ss:$8 sps:$4 sm:$0xff]  }
 0x18b   : > { %1555 = vmatprep.subr.bf16.mxu1 %v1996_v0 }
 0x18e   : > { %1556 = vmatpush3.bf16.msra.mxu1 %v1713_v39  ;;  %v1745_v39 = vld [vmem:[#allocation8 + $0x54] ss:$8 sps:$4 sm:$0xff]  }
 0x18f   : > { %1557 = vmatprep.subr.bf16.mxu1 %v1996_v0 }
 0x192   : > { %1558 = vmatpush3.bf16.msra.mxu1 %v1714_v40  ;;  %v1743_v40 = vld [vmem:[#allocation8 + $0x50] ss:$8 sps:$4 sm:$0xff]  }
 0x193   : > { %1559 = vmatprep.subr.bf16.mxu1 %v1996_v0 }
 0x196   : > { %1560 = vmatpush3.bf16.msra.mxu1 %v1715_v41 }
 0x197   : > { %1565 = vmatprep.subr.bf16.mxu1 %v1996_v0 }
 0x25c   : > { %v737_v43 = vpop.f32.mrb[0].mxu1 }
 0x25d   : > { %v738_v44 = vadd.f32 %v1426_v42, %v737_v43  ;;  %v1551_v45 = vpop.f32.mrb[1].mxu1  ;;  %v1748_v42 = vld [vmem:[#allocation8 + $0x64] ss:$8 sps:$4 sm:$0xff]   ;;  %v1746_v43 = vld [vmem:[#allocation8 + $0x60] ss:$8 sps:$4 sm:$0xff]  }
 0x25e   : > { %v740_v46 = vpop.f32.mrb[2].mxu1  ;;  %v1749_v45 = vld [vmem:[#allocation8 + $0x70] ss:$8 sps:$4 sm:$0xff]  }
 0x25f   : > { %v743_v47 = vmax.f32 %v738_v44, 0.0  ;;  %v1552_v48 = vpop.f32.mrb[3].mxu1  ;;  %v1751_v44 = vld [vmem:[#allocation8 + $0x74] ss:$8 sps:$4 sm:$0xff]   ;;  %v1999_v46 = vmov 0  }
 0x261   : > { %v744_v49 = vpack.c.bf16 %v743_v47, %v743_v47 }
 0x263   : > { %1562 = vmatmul.mubr.msk.bf16.vlgmr.msra.gmra.mrb[4].mxu1 %vm784_vm1, %v744_v49 }
 0x264   : > { %1581 = vmatprep.mubr.msk.bf16.mxu1 %vm1997_vm0, %v1996_v0  ;;  %1566 = vmatpush3.bf16.msra.mxu1 %v1716_v50 }
 0x265   : > { %1567 = vmatprep.subr.bf16.mxu1 %v1996_v0 }
 0x268   : > { %1568 = vmatpush3.bf16.msra.mxu1 %v1717_v51  ;;  %v1450_v51 = vld [vmem:[%s2517_s8 + $0x4] ss:$0 sm:$0xff] }
 0x269   : > { %1569 = vmatprep.subr.bf16.mxu1 %v1996_v0 }
 0x26c   : > { %1570 = vmatpush3.bf16.msra.mxu1 %v1718_v52 }
 0x26d   : > { %1571 = vmatprep.subr.bf16.mxu1 %v1996_v0 }
 0x270   : > { %1572 = vmatpush3.bf16.msra.mxu1 %v1719_v53 }
 0x271   : > { %1573 = vmatprep.subr.bf16.mxu1 %v1996_v0 }
 0x274   : > { %1574 = vmatpush3.bf16.msra.mxu1 %v1720_v54 }
 0x275   : > { %1575 = vmatprep.subr.bf16.mxu1 %v1996_v0 }
 0x278   : > { %1576 = vmatpush3.bf16.msra.mxu1 %v1721_v55 }
 0x279   : > { %1577 = vmatprep.subr.bf16.mxu1 %v1996_v0 }
 0x27c   : > { %1578 = vmatpush3.bf16.msra.mxu1 %v1722_v58 }
 0x27d   : > { %1579 = vmatprep.subr.bf16.mxu1 %v1996_v0 }
 0x280   : > { %1580 = vmatpush3.bf16.msra.mxu1 %v1723_v63 }
 0x336   : > { %v822_v57 = vpop.f32.mrb[4].mxu1 }
 0x337   : > { %v823_v59 = vadd.f32 %v1435_v56, %v822_v57  ;;  %v1563_v60 = vpop.f32.mrb[5].mxu1 }
 0x338   : > { %v825_v61 = vpop.f32.mrb[6].mxu1 }
 0x339   : > { %832 = vrot.lane.b32.xlu0 %v823_v59, %s1998_s18  ;;  %v1564_v62 = vpop.f32.mrb[7].mxu1  ;;  %v831_v9 = vsel %vm830_vm2, %v823_v59, 0.0  ;;  %s2436_s18 = scalar_lea.hbm %s2547_s27, %s1476_s26 }
 0x3ab   : > { %v833_v1 = vpop.permute.xlu0 %832 }
 0x3ac   : > { %v835_v2 = vmul.f32 0.5, %v833_v1 }
 0x3ae   : > { %v836_v3 = vmul.f32 1.442695, %v835_v2 }
 0x3b0   : > { %1752 = vpow2.f32 %v836_v3 }
 0x3ba   : > { %v1753_v7 = vpop.eup %1752 }
 0x3bb   : > { %v838_v8 = vmul.f32 %v1753_v7, %v834_v6 }
 0x3bd   : > { %v2411_v10 = vadd.f32 %v838_v8, %v831_v9 }
 0x3bf   : > { %v840_v11 = vsel %vm830_vm2, %v2411_v10, -inf  ;;  %v855_v12 = vpack.c.bf16 %v2411_v10, %v2411_v10 }
 0x3c0   : > { %841 = vmax.xlane.f32.xlu0 %v840_v11 }
 0x3c1   : > { %1582 = vmatmul.mubr.bf16.vlgmr.msra.gmra.mrb[8].mxu1 %v855_v12 }
 0x44d   : > { %v842_v17 = vpop.xlane.xlu0 %841 }
 0x44e   : > { %v843_v18 = vsub.f32 %v2411_v10, %v842_v17 }
 0x450   : > { %v844_v19 = vmul.f32 1.442695, %v843_v18 }
 0x452   : > { %1754 = vpow2.f32 %v844_v19 }
 0x45c   : > { %v1755_v20 = vpop.eup %1754 }
 0x45d   : > { %v846_v21 = vsel %vm830_vm2, %v1755_v20, 0.0 }
 0x45e   : > { %847 = vadd.xlane.f32.xlu1 %v846_v21 }
 0x494   : > { %v961_v24 = vpop.f32.mrb[8].mxu1 }
 0x495   : > { %v962_v25 = vadd.f32 %v1441_v23, %v961_v24  ;;  %v1583_v0 = vpop.f32.mrb[9].mxu1 }
 0x496   : > { %v964_v26 = vpop.f32.mrb[10].mxu1 }
 0x497   : > { %v967_v27 = vmax.f32 %v962_v25, 0.0  ;;  %v1584_v28 = vpop.f32.mrb[11].mxu1 }
 0x499   : > { %v968_v30 = vpack.c.bf16 %v967_v27, %v967_v27 }
 0x49b   : > { %1594 = vmatmul.mubr.msk.bf16.vlgmr.msra.gmra.mrb[4].mxu0 %vm784_vm1, %v968_v30 }
 0x49c   : > { %1162 = vmatpush1.bf16.msra.mxu0 %v1728_v29  ;;  %1193 = vmatprep.mubr.bf16.mxu0 %v1999_v46 }
 0x49d   : > { %1163 = vmatprep.subr.bf16.mxu0 %v1733_v31 }
 0x4a0   : > { %1164 = vmatpush1.bf16.msra.mxu0 %v1731_v32 }
 0x4a1   : > { %1165 = vmatprep.subr.bf16.mxu0 %v1736_v33 }
 0x4a4   : > { %1166 = vmatpush1.bf16.msra.mxu0 %v1734_v34 }
 0x4a5   : > { %1167 = vmatprep.subr.bf16.mxu0 %v1739_v35 }
 0x4a8   : > { %1168 = vmatpush1.bf16.msra.mxu0 %v1737_v36 }
 0x4a9   : > { %1169 = vmatprep.subr.bf16.mxu0 %v1742_v37 }
 0x4ac   : > { %1170 = vmatpush1.bf16.msra.mxu0 %v1740_v38 }
 0x4ad   : > { %1171 = vmatprep.subr.bf16.mxu0 %v1745_v39 }
 0x4b0   : > { %1172 = vmatpush1.bf16.msra.mxu0 %v1743_v40 }
 0x4b1   : > { %1173 = vmatprep.subr.bf16.mxu0 %v1748_v42 }
 0x4b4   : > { %1174 = vmatpush1.bf16.msra.mxu0 %v1746_v43 }
 0x4b5   : > { %1175 = vmatprep.subr.bf16.mxu0 %v1751_v44 }
 0x4b8   : > { %1176 = vmatpush1.bf16.msra.mxu0 %v1749_v45 }
 0x4eb   : > { %v848_v41 = vpop.xlane.xlu1 %847 }
 0x4ec   : > { %1756 = vrcp.f32 %v848_v41 }
 0x4f6   : > { %v1757_v47 = vpop.eup %1756 }
 0x4f7   : > { %v850_v48 = vmul.f32 %v1757_v47, %v846_v21 }
 0x4f9   : > { %851 = vrot.lane.b32.xlu1 %v850_v48, %s2000_s19  ;;  %s1884_s19 = sshll.u32 %s2001_s10, 4  ;;  %s1885_s19 = int_to_ptr.vmem [resolvable:$false] %s1884_s19 }
 0x4fa   : > { %s1886_s29 = scalar_lea.vmem %s1885_s19, 256  ;;  %p1887_p2 = scmp.lt.s32.totalorder %s1236_s23, %s1885_s19 }
 0x4fb   : > { %p1888_p1 = scmp.lt.s32.totalorder %s1886_s29, %s1880_s28 }
 0x4fd   : > { %p1889_p4 = por %p1888_p1, %p1887_p2 }
 0x4ff   : > { %p1890_p0 = pnand %p1889_p4, %p1883_p12 }
 0x56b   : > { %v852_v49 = vpop.permute.xlu1 %851 }
 0x56c   : > { %v853_v50 = vadd.f32 %v852_v49, %v2411_v10 }
 0x56e   : > { %854 = vst [vmem:[%s437_s25] sm:$0xff] %v853_v50  ;;  %v1045_v52 = vpop.f32.mrb[4].mxu0 }
 0x56f   : > { %v1046_v53 = vadd.f32 %v1450_v51, %v1045_v52  ;;  %v1595_v54 = vpop.f32.mrb[5].mxu0 }
 0x570   : > { %v1048_v55 = vpop.f32.mrb[6].mxu0 }
 0x571   : > { %v1051_v56 = vmax.f32 %v1046_v53, 0.0  ;;  %v1596_v57 = vpop.f32.mrb[7].mxu0 }
 0x573   : > { %v1052_v58 = vpack.c.bf16 %v1051_v56, %v1051_v56 }
 0x575   : > { %1194 = vmatmul.mubr.bf16.vlgmr.msra.gmra.mrb[8].mxu0 %v1052_v58 }
 0x576   : > { %1893 = shalt.err (!%p1890_p0)
}
 0x577   : > { %s1894_s22 = scalar_lea.hbm %s2436_s18, 128  ;;  %s1898_s26 = scalar_lea.hbm %s2547_s27, 256 }
 0x578   : > { %p1895_p9 = scmp.ne.s32.totalorder %s2436_s18, %s1894_s22  ;;  %p1899_p13 = scmp.lt.u32.totalorder %s2436_s18, %s2547_s27 }
 0x579   : > { %p1900_p6 = scmp.lt.u32.totalorder %s1898_s26, %s1894_s22  ;;  %p1902_p3 = scmp.lt.u32.totalorder %s1894_s22, %s2436_s18 }
 0x57a   : > { %p1896_p11 = pnand %p1895_p9, %p2203_p5 }
 0x57b   : > { %p1901_p10 = por %p1900_p6, %p1899_p13 }
 0x57c   : > { %p1897_p8 = pneg %p1896_p11 }
 0x57d   : > { %p1903_p7 = por %p1902_p3, %p1901_p10 }
 0x57f   : > { %p1904_p12 = pnand %p1903_p7, %p1897_p8 }
 0x581   : > { %1907 = shalt.err (!%p1904_p12)
}
 0x582   : > { %1611 = dma.vmem_to_hbm [thread:$0]  (%p2203_p5), %s1236_s23, 128, %s2436_s18, %s1217_s21   ;;  %v1072_v59 = vshrl.u32 %v828_v4, 7  ;;  %v1069_v61 = vld [vmem:[%s2517_s8 + $0x5] sm:$0x3] }
 0x583   : > { %s1406_s18 = sshll.u32 %s2248_s11, 4  ;;  %s1482_s23 = sshll.u32 %s2079_s17, 8 }
 0x584   : > { %v1073_v60 = vsub.s32 0, %v1072_v59  ;;  %v1077_v62 = vsub.s32 1, %v1072_v59  ;;  %s444_s21 = scalar_lea.vmem [#allocation11], %s1406_s18  ;;  %s2548_s30 = sld [smem:[#allocation21_spill]] }
 0x585   : > { %s1249_s19 = sshll.u32 %s444_s21, 4  ;;  %s1222_s26 = scalar_lea.sflag [#allocation12], %s2248_s11  ;;  %s2467_s19 = int_to_ptr.vmem [resolvable:$true] %s1249_s19 }
 0x586   : > { %v1074_v63 = vrot.slane %v1069_v61, %v1073_v60  ;;  %v1078_v1 = vrot.slane %v1069_v61, %v1077_v62  ;;  %s1908_s24 = scalar_lea.vmem %s2467_s19, 256  ;;  %s2002_s17 = smov [#allocation11]  }
 0x587   : > { %p1909_p2 = scmp.ne.s32.totalorder %s2467_s19, %s1908_s24  ;;  %s1912_s13 = sshll.u32 %s2002_s17, 4  ;;  %s1913_s13 = int_to_ptr.vmem [resolvable:$false] %s1912_s13 }
 0x588   : > { %s1914_s28 = scalar_lea.vmem %s1913_s13, 512  ;;  %p1915_p0 = scmp.lt.s32.totalorder %s2467_s19, %s1913_s13 }
 0x589   : > { %p1910_p1 = pnand %p1909_p2, %p2203_p5  ;;  %p1916_p9 = scmp.lt.s32.totalorder %s1914_s28, %s1908_s24 }
 0x58a   : > { %s2465_s25 = scalar_lea.hbm %s2548_s30, %s1482_s23 }
 0x58b   : > { %p1911_p4 = pneg %p1910_p1  ;;  %p1917_p11 = por %p1916_p9, %p1915_p0 }
 0x58d   : > { %p1918_p8 = pnand %p1917_p11, %p1911_p4 }
 0x648   : > { %v1195_v2 = vpop.f32.mrb[8].mxu0 }
 0x649   : > { %v1196_v3 = vadd.f32 %v1195_v2, %v1074_v63  ;;  %v1197_v5 = vpop.f32.mrb[9].mxu0 }
 0x64a   : > { %v1198_v6 = vadd.f32 %v1197_v5, %v1078_v1  ;;  %v1199_v7 = vpop.f32.mrb[10].mxu0 }
 0x64b   : > { %v1472_v8 = vmul.f32 -1.442695, %v1196_v3  ;;  %v1200_v9 = vpop.f32.mrb[11].mxu0 }
 0x64c   : > { %v1473_v10 = vmul.f32 -1.442695, %v1198_v6 }
 0x64d   : > { %1758 = vpow2.f32 %v1472_v8 }
 0x64e   : > { %1760 = vpow2.f32 %v1473_v10 }
 0x657   : > { %v1759_v4 = vpop.eup %1758 }
 0x658   : > { %v1761_v11 = vpop.eup %1760  ;;  %v1208_v12 = vadd.f32 1.0, %v1759_v4 }
 0x659   : > { %v1209_v13 = vadd.f32 1.0, %v1761_v11 }
 0x65a   : > { %1762 = vrcp.f32 %v1208_v12 }
 0x65b   : > { %1764 = vrcp.f32 %v1209_v13 }
 0x664   : > { %v1763_v14 = vpop.eup %1762 }
 0x665   : > { %v1765_v15 = vpop.eup %1764  ;;  %1214 = vst [vmem:[%s444_s21] sm:$0xff] %v1763_v14 }
 0x666   : > { %1215 = vst [vmem:[%s444_s21 + $0x8] sm:$0xff] %v1765_v15 }
 0x667   : > { %1921 = shalt.err (!%p1918_p8)
}
 0x668   : > { %s1922_s11 = scalar_lea.hbm %s2465_s25, 256  ;;  %s1926_s23 = scalar_lea.hbm %s2548_s30, 512 }
 0x669   : > { %p1923_p13 = scmp.ne.s32.totalorder %s2465_s25, %s1922_s11  ;;  %p1927_p3 = scmp.lt.u32.totalorder %s2465_s25, %s2548_s30 }
 0x66a   : > { %p1928_p7 = scmp.lt.u32.totalorder %s1926_s23, %s1922_s11  ;;  %p1930_p2 = scmp.lt.u32.totalorder %s1922_s11, %s2465_s25 }
 0x66b   : > { %p1924_p6 = pnand %p1923_p13, %p2203_p5 }
 0x66c   : > { %p1929_p12 = por %p1928_p7, %p1927_p3 }
 0x66d   : > { %p1925_p10 = pneg %p1924_p6 }
 0x66e   : > { %p1931_p1 = por %p1930_p2, %p1929_p12 }
 0x670   : > { %p1932_p4 = pnand %p1931_p1, %p1925_p10 }
 0x672   : > { %1935 = shalt.err (!%p1932_p4)
}
 0x673   : > { %1612 = dma.vmem_to_hbm [thread:$0]  (%p2203_p5), %s2467_s19, 256, %s2465_s25, %s1222_s26  }
 0x674 PF: > { %s2549_s22 = sld [smem:[#allocation18_spill]]  ;;  %s2550_s24 = sld [smem:[#allocation19_spill]] }
 0x675   : > { %p2552_p9 = scmp.ge.s32.totalorder %s1986_s16, 2 }
 0x67a   : > { %s1261_s17 = sand.u32 1, %s2549_s22   ;;  %p2551_p0 = scmp.ne.s32.totalorder %s2550_s24, 0 }
 0x67b   : > { %s1262_s13 = scalar_lea.sflag [#allocation4], %s1261_s17 }
 0x67c   : > { %p1630_p11 = pnand %p2552_p9, %p2551_p0 }
 0x67e   : > { %1965 = dma.done.wait (!%p1630_p11), %s1262_s13, 128  }
 0x67f   : > { %1967 = vsyncadd (!%p1630_p11), %s1262_s13, 4294967168  ;;  %s1271_s28 = scalar_lea.sflag [#allocation12], %s1261_s17 }
 0x680   : > { %1969 = dma.done.wait (!%p1630_p11), %s1271_s28, 256  }
 0x681   : > { %1971 = vsyncadd (!%p1630_p11), %s1271_s28, 4294967040  ;;  %p29_p5 = scmp.ge.s32.totalorder %s2189_s9, 4   ;;  %s2553_s13 = smov %s1978_s14 }
 0x682   : > { %s2554_s14 = smov %s1982_s15  ;;  %s2555_s15 = smov %s2199_s20 }
 0x683   : > { %s2556_s16 = smov %s2189_s9  ;;  %31 = sbr.rel (!%p29_p5) target bundleno = 12 (0xc), region = 133 }
 0x68a   :  { %1276 = vsyncpa [#allocation3], 1 }
 0x68b   :  { %1278 = vsyncpa [#allocation3 + $0x1], 1 }
 0x68c   :  { %1279 = vsyncpa [#allocation6], 1 }
 0x68d   :  { %1280 = vsyncpa [#allocation9], 1 }
 0x68e   :  { %1281 = vsyncpa [#allocation4], 1 }
 0x68f   :  { %1283 = vsyncpa [#allocation4 + $0x1], 1 }
 0x690   :  { %1284 = vsyncpa [#allocation12], 1 }
 0x691   :  { %1286 = vsyncpa [#allocation12 + $0x1], 1 }

</bundles_post_ra>
